<compile_context>
chip_gen: v6e
topology: v6e:2x2x1
jax: 0.10.0
libtpu: 0.0.40
codegen_flags: <defaults>
</compile_context>

<pallas_src>
import jax
import jax.numpy as jnp
from jax import lax
from jax.experimental import pallas as pl
from jax.experimental.pallas import tpu as pltpu


def _align8(n):
    return (n + 7) // 8 * 8


def _param_offsets(C, planes):
    """8-row-aligned section offsets inside the packed parameter array."""
    p2 = 2 * planes
    off = {}
    off["wmask"] = 0                                  # (1, C)
    off["wA"] = 8                                     # (2p, C)  [w1a; w2a]
    off["wB"] = off["wA"] + _align8(p2)               # (C, 2p)  [w1b | w2b]
    off["bA"] = off["wB"] + _align8(C)                # (2p, 1)  [b1a; b2a]
    off["bB"] = off["bA"] + _align8(p2)               # (C, 2)   [b1b | b2b]
    off["wc1"] = off["bB"] + _align8(C)               # (C, C)   wc[:, :C]
    off["wc2"] = off["wc1"] + _align8(C)              # (C, C)   wc[:, C:]
    off["w7"] = off["wc2"] + _align8(C)               # (8, 16)  padded tap mix
    off["_rows"] = off["w7"] + 8
    off["_lanes"] = max(C, 2 * planes, 16)
    return off


def pack_params(params, C, planes):
    off = _param_offsets(C, planes)
    R, L = off["_rows"], off["_lanes"]
    p2 = 2 * planes
    P = jnp.zeros((R, L), jnp.float32)
    P = P.at[off["wmask"], 0:C].set(params["wmask"].reshape(C).astype(jnp.float32))
    P = P.at[off["wA"]:off["wA"] + p2, 0:C].set(
        jnp.concatenate([params["w1a"], params["w2a"]], axis=0).astype(jnp.float32))
    P = P.at[off["wB"]:off["wB"] + C, 0:p2].set(
        jnp.concatenate([params["w1b"], params["w2b"]], axis=1).astype(jnp.float32))
    P = P.at[off["bA"]:off["bA"] + p2, 0].set(
        jnp.concatenate([params["b1a"], params["b2a"]], axis=0).astype(jnp.float32))
    P = P.at[off["bB"]:off["bB"] + C, 0].set(params["b1b"].astype(jnp.float32))
    P = P.at[off["bB"]:off["bB"] + C, 1].set(params["b2b"].astype(jnp.float32))
    P = P.at[off["wc1"]:off["wc1"] + C, 0:C].set(params["wc"][:, 0:C].astype(jnp.float32))
    P = P.at[off["wc2"]:off["wc2"] + C, 0:C].set(params["wc"][:, C:2 * C].astype(jnp.float32))
    # 7x7 tap-mix weight: column 2*dx + c holds w7[c, dy, dx] (c=0 avg, c=1 max),
    # zero-padded to an (8, 16) MXU-friendly tile.
    w7 = params["w7"].reshape(2, 7, 7).astype(jnp.float32)
    w7i = jnp.transpose(w7, (1, 2, 0)).reshape(7, 14)
    P = P.at[off["w7"]:off["w7"] + 7, 0:14].set(w7i)
    return P, off


def make_cmgc_kernel(H, W, C, planes, off):
    HW = H * W
    p = planes
    p2 = 2 * planes
    # The roll factorization of the 7x7 conv assumes the 3-pixel halo never
    # wraps a full row / full map; masks are applied BEFORE the dy mixing.
    assert H >= 4 and W >= 4, "7x7 conv factorization requires H >= 4 and W >= 4"

    def kernel(x1_ref, x2_ref, pp_ref, out_ref):
        x1 = x1_ref[0]                                                  # (C, HW)
        x2 = x2_ref[0]                                                  # (C, HW)

        # ---- packed parameters (static slices of the single param block) ----
        wmask = pp_ref[off["wmask"]:off["wmask"] + 1, 0:C]              # (1, C)
        wA = pp_ref[off["wA"]:off["wA"] + p2, 0:C]                      # (2p, C)
        wB = pp_ref[off["wB"]:off["wB"] + C, 0:p2]                      # (C, 2p)
        bA = pp_ref[off["bA"]:off["bA"] + p2, 0:1]                      # (2p, 1)
        bB = pp_ref[off["bB"]:off["bB"] + C, 0:2]                       # (C, 2)
        wc1 = pp_ref[off["wc1"]:off["wc1"] + C, 0:C]                    # (C, C)
        wc2 = pp_ref[off["wc2"]:off["wc2"] + C, 0:C]                    # (C, C)
        w7m = pp_ref[off["w7"]:off["w7"] + 8, 0:16]                     # (8, 16)

        # ---- gate phase: both cross-modal gates batched ----
        # conv_mask logits (bias dropped: softmax is shift-invariant).
        lg1 = jnp.dot(wmask, x2, preferred_element_type=jnp.float32)    # gate for x1
        lg2 = jnp.dot(wmask, x1, preferred_element_type=jnp.float32)    # gate for x2
        logits = jnp.concatenate([lg1, lg2], axis=0)                    # (2, HW)
        m = jnp.max(logits, axis=1, keepdims=True)
        e = jnp.exp(logits - m)
        denom = jnp.sum(e, axis=1, keepdims=True)
        att = e * (1.0 / denom)        # exact reciprocal (review correctness note)

        # context vectors: contract the long HW axis on the MXU.
        ctx1 = lax.dot_general(x1, att[0:1, :], (((1,), (1,)), ((), ())),
                               preferred_element_type=jnp.float32)      # (C, 1)
        ctx2 = lax.dot_general(x2, att[1:2, :], (((1,), (1,)), ((), ())),
                               preferred_element_type=jnp.float32)      # (C, 1)
        ctx = jnp.concatenate([ctx1, ctx2], axis=1)                     # (C, 2)

        # Both 2-layer channel MLPs as two block-stacked dots; the hidden
        # layer's off-diagonal blocks are discarded before layer 2.
        h = jnp.dot(wA, ctx, preferred_element_type=jnp.float32) + bA   # (2p, 2)
        h = jnp.maximum(h, 0.0)
        row = lax.broadcasted_iota(jnp.int32, (p2, 2), 0)
        colp = lax.broadcasted_iota(jnp.int32, (p2, 2), 1)
        h = jnp.where((row < p) == (colp == 0), h, 0.0)
        y2 = jnp.dot(wB, h, preferred_element_type=jnp.float32) + bB    # (C, 2)
        s = jax.nn.sigmoid(y2)
        s1 = s[:, 0:1]
        s2 = s[:, 1:2]

        # Scaled halves stay register/temporary-resident: consumed by the
        # channel statistics and the split fusion conv, never re-staged.
        g1 = x1 * s1                                                    # (C, HW)
        g2 = x2 * s2                                                    # (C, HW)

        # Channel statistics over the 2C concatenated channels.
        # NOTE: for production C (>=32) fold the mean into the fusion-conv dot
        # by appending a ones/(2C) row to wc1/wc2 (the extra MXU row is free);
        # at small C the exact sublane reduce is cheaper and bit-accurate.
        ssum = (jnp.sum(g1, axis=0, keepdims=True)
                + jnp.sum(g2, axis=0, keepdims=True))                   # (1, HW)
        avg = ssum * (1.0 / (2.0 * C))
        mxv = jnp.maximum(jnp.max(g1, axis=0, keepdims=True),
                          jnp.max(g2, axis=0, keepdims=True))           # (1, HW)

        # ---- 7x7 "same" spatial-attention conv, factorized dx-then-dy ----
        col = lax.broadcasted_iota(jnp.int32, (1, HW), 1) % W
        idx = lax.broadcasted_iota(jnp.int32, (1, HW), 1)

        # dx pass: avg/max stacked -> 6 rolls of a (2,HW) value, one
        # single-sided column mask per nonzero dx; the slab is built as a
        # value (no per-row scratch stores) and zero-padded to 16 sublanes.
        am = jnp.concatenate([avg, mxv], axis=0)                        # (2, HW)
        parts = []
        for dx in range(7):
            ox = dx - 3
            if ox == 0:
                parts.append(am)
            else:
                r = pltpu.roll(am, shift=(-ox) % HW, axis=1)
                cm = (col < W - ox) if ox > 0 else (col >= -ox)
                parts.append(jnp.where(cm, r, 0.0))
        parts.append(jnp.zeros((2, HW), jnp.float32))                   # pad -> 16 rows
        slab = jnp.concatenate(parts, axis=0)                           # (16, HW)

        # All 2x49 taps mixed for every dy in one (8,16)@(16,HW) MXU dot.
        gdy = jnp.dot(w7m, slab, preferred_element_type=jnp.float32)    # (8, HW)

        # dy pass: single-sided row masks, pairwise-tree accumulation.
        terms = []
        for dy in range(7):
            oy = dy - 3
            if oy == 0:
                terms.append(gdy[3:4, :])
            else:
                sh = oy * W
                r = pltpu.roll(gdy[dy:dy + 1, :], shift=(-sh) % HW, axis=1)
                rm = (idx < HW - sh) if oy > 0 else (idx >= -sh)
                terms.append(jnp.where(rm, r, 0.0))
        while len(terms) > 1:
            nxt = [terms[i] + terms[i + 1] for i in range(0, len(terms) - 1, 2)]
            if len(terms) % 2:
                nxt.append(terms[-1])
            terms = nxt
        smask = jax.nn.sigmoid(terms[0])                                # (1, HW)

        # ---- fused 1x1 fusion conv, split per half (no (2C,HW) staging) ----
        yout = (jnp.dot(wc1, g1, preferred_element_type=jnp.float32)
                + jnp.dot(wc2, g2, preferred_element_type=jnp.float32))  # (C, HW)
        out_ref[0] = (yout * smask).astype(out_ref.dtype)

    return kernel


def cmgc_forward(x1, x2, params):
    B, C, H, W = x1.shape
    HW = H * W
    planes = params["w1a"].shape[0]

    # TODO(synk): for arbitrary H,W pad HW up to a multiple of 128 (with masked
    # softmax / channel stats) so output stores stay lane-dense; 16x16=256 and
    # typical production maps already satisfy HW % 128 == 0.

    x1f = x1.reshape(B, C, HW)
    x2f = x2.reshape(B, C, HW)
    P, off = pack_params(params, C, planes)

    kernel = make_cmgc_kernel(H, W, C, planes, off)

    x_spec = pl.BlockSpec((1, C, HW), lambda b: (b, 0, 0))
    p_spec = pl.BlockSpec(P.shape, lambda b: (0, 0))

    # VMEM budget per grid step: x1/x2/out blocks double-buffered + compiler
    # temporaries for the gated halves and the 7x7 slab + the packed params.
    # Budgeted against v7x's 64 MiB per-core VMEM; v5e/v6e get more headroom.
    blk = C * HW * 4
    resident = 3 * 2 * blk + 8 * blk + 32 * HW * 4 + P.size * 4 + (64 << 10)
    vmem_limit = int(min(max(2 * resident, 32 << 20), 64 << 20))

    flops = 2 * B * HW * (4 * C + 2 * C * C + 8 * 16) + 16 * B * planes * C
    transc = B * (3 * HW + 4 * C)
    bytes_acc = B * 3 * C * HW * x1.dtype.itemsize + P.size * 4

    out = pl.pallas_call(
        kernel,
        out_shape=jax.ShapeDtypeStruct((B, C, HW), x1.dtype),
        grid=(B,),
        in_specs=[x_spec, x_spec, p_spec],
        out_specs=pl.BlockSpec((1, C, HW), lambda b: (b, 0, 0)),
        compiler_params=pltpu.CompilerParams(
            dimension_semantics=("parallel",),
            vmem_limit_bytes=vmem_limit),
        cost_estimate=pl.CostEstimate(
            flops=int(flops), transcendentals=int(transc),
            bytes_accessed=int(bytes_acc)),
    )(x1f, x2f, P)
    return out.reshape(B, C, H, W)


def reference_forward(x1, x2, p):
    """Pure-JAX re-implementation of the PyTorch forward (for verification)."""
    B, C, H, W = x1.shape
    HW = H * W

    def spatial_pool(xv, xm):
        logits = jnp.einsum("c,bchw->bhw", p["wmask"], xm) + p["bmask"]
        att = jax.nn.softmax(logits.reshape(B, HW), axis=-1)
        return jnp.einsum("bcs,bs->bc", xv.reshape(B, C, HW), att)

    def mlp(ctx, wa, ba, wb, bb):
        h = jax.nn.relu(ctx @ wa.T + ba)
        return h @ wb.T + bb

    ctx1 = spatial_pool(x1, x2)
    ctx2 = spatial_pool(x2, x1)
    s1 = jax.nn.sigmoid(mlp(ctx1, p["w1a"], p["b1a"], p["w1b"], p["b1b"]))
    s2 = jax.nn.sigmoid(mlp(ctx2, p["w2a"], p["b2a"], p["w2b"], p["b2b"]))
    out1 = x1 * s1[:, :, None, None]
    out2 = x2 * s2[:, :, None, None]
    cat = jnp.concatenate([out1, out2], axis=1)
    avg = jnp.mean(cat, axis=1, keepdims=True)
    mx = jnp.max(cat, axis=1, keepdims=True)
    sa_in = jnp.concatenate([avg, mx], axis=1)               # (B, 2, H, W)
    mask = lax.conv_general_dilated(
        sa_in, p["w7"][None], window_strides=(1, 1),
        padding=[(3, 3), (3, 3)],
        dimension_numbers=("NCHW", "OIHW", "NCHW"))
    mask = jax.nn.sigmoid(mask)                              # (B, 1, H, W)
    y = jnp.einsum("oc,bchw->bohw", p["wc"], cat)
    return y * mask


if __name__ == "__main__":
    B, C, H, W, ratio = 2, 4, 16, 16, 2
    planes = C // ratio

    key = jax.random.PRNGKey(0)
    ks = jax.random.split(key, 16)

    def nrm(k, shape, scale=0.3):
        return (scale * jax.random.normal(k, shape)).astype(jnp.float32)

    # deterministic synthetic parameters matching the nn.Module shapes
    params = dict(
        wmask=nrm(ks[0], (C,)),            # conv_mask: Conv2d(C,1,1) weight
        bmask=nrm(ks[1], ()),              # conv_mask bias (no-op under softmax)
        w1a=nrm(ks[2], (planes, C)),       # channel_mul_conv1[0]
        b1a=nrm(ks[3], (planes,)),
        w1b=nrm(ks[4], (C, planes)),       # channel_mul_conv1[2]
        b1b=nrm(ks[5], (C,)),
        w2a=nrm(ks[6], (planes, C)),       # channel_mul_conv2[0]
        b2a=nrm(ks[7], (planes,)),
        w2b=nrm(ks[8], (C, planes)),       # channel_mul_conv2[2]
        b2b=nrm(ks[9], (C,)),
        w7=nrm(ks[10], (2, 7, 7)),         # conv2d: Conv2d(2,1,7,pad=3,bias=False)
        wc=nrm(ks[11], (C, 2 * C)),        # conv: Conv2d(2C,C,1,bias=False)
    )
    x1 = jax.random.normal(ks[12], (B, C, H, W), jnp.float32)
    x2 = jax.random.normal(ks[13], (B, C, H, W), jnp.float32)

    out = jax.block_until_ready(cmgc_forward(x1, x2, params))
    ref = jax.block_until_ready(reference_forward(x1, x2, params))

    assert out.shape == (B, C, H, W)
    # Tolerance accounts for default (single-pass bf16) MXU precision in both
    # the kernel and the pure-JAX reference.
    if not jnp.allclose(out, ref, atol=2e-2, rtol=2e-2):
        raise AssertionError(
            f"mismatch vs reference, max abs err = {jnp.max(jnp.abs(out - ref))}")
    print("KERNEL_OK")
</pallas_src>

<mosaic_0001>
module attributes {stable_mosaic.version = 11 : i64} {
  func.func @kernel(%arg0: i32, %arg1: memref<1x4x256xf32, #tpu.memory_space<vmem>>, %arg2: memref<1x4x256xf32, #tpu.memory_space<vmem>>, %arg3: memref<64x16xf32, #tpu.memory_space<vmem>>, %arg4: memref<1x4x256xf32, #tpu.memory_space<vmem>>) attributes {dimension_semantics = [#tpu.dimension_semantics<parallel>], iteration_bounds = array<i64: 2>, scalar_prefetch = 0 : i64, scratch_operands = 0 : i64, tpu.core_type = #tpu.core_type<tc>, window_params = [{transform_indices = @transform_0, window_bounds = array<i64: 1, 4, 256>}, {transform_indices = @transform_1, window_bounds = array<i64: 1, 4, 256>}, {pipeline_mode = #tpu.pipeline_mode<synchronous>, transform_indices = @transform_2, window_bounds = array<i64: 64, 16>}, {transform_indices = @transform_3, window_bounds = array<i64: 1, 4, 256>}]} {
    %c0 = arith.constant 0 : index
    %c0_0 = arith.constant 0 : index
    %c0_1 = arith.constant 0 : index
    %0 = vector.load %arg1[%c0, %c0_0, %c0_1] : memref<1x4x256xf32, #tpu.memory_space<vmem>>, vector<1x4x256xf32>
    %1 = vector.shape_cast %0 : vector<1x4x256xf32> to vector<4x256xf32>
    %c0_2 = arith.constant 0 : index
    %c0_3 = arith.constant 0 : index
    %c0_4 = arith.constant 0 : index
    %2 = vector.load %arg2[%c0_2, %c0_3, %c0_4] : memref<1x4x256xf32, #tpu.memory_space<vmem>>, vector<1x4x256xf32>
    %3 = vector.shape_cast %2 : vector<1x4x256xf32> to vector<4x256xf32>
    %c0_5 = arith.constant 0 : index
    %c0_6 = arith.constant 0 : index
    %4 = vector.load %arg3[%c0_5, %c0_6] : memref<64x16xf32, #tpu.memory_space<vmem>>, vector<1x4xf32>
    %c8 = arith.constant 8 : index
    %c0_7 = arith.constant 0 : index
    %5 = vector.load %arg3[%c8, %c0_7] : memref<64x16xf32, #tpu.memory_space<vmem>>, vector<4x4xf32>
    %c16 = arith.constant 16 : index
    %c0_8 = arith.constant 0 : index
    %6 = vector.load %arg3[%c16, %c0_8] : memref<64x16xf32, #tpu.memory_space<vmem>>, vector<4x4xf32>
    %c24 = arith.constant 24 : index
    %c0_9 = arith.constant 0 : index
    %7 = vector.load %arg3[%c24, %c0_9] : memref<64x16xf32, #tpu.memory_space<vmem>>, vector<4x1xf32>
    %c32 = arith.constant 32 : index
    %c0_10 = arith.constant 0 : index
    %8 = vector.load %arg3[%c32, %c0_10] : memref<64x16xf32, #tpu.memory_space<vmem>>, vector<4x2xf32>
    %c40 = arith.constant 40 : index
    %c0_11 = arith.constant 0 : index
    %9 = vector.load %arg3[%c40, %c0_11] : memref<64x16xf32, #tpu.memory_space<vmem>>, vector<4x4xf32>
    %c48 = arith.constant 48 : index
    %c0_12 = arith.constant 0 : index
    %10 = vector.load %arg3[%c48, %c0_12] : memref<64x16xf32, #tpu.memory_space<vmem>>, vector<4x4xf32>
    %c56 = arith.constant 56 : index
    %c0_13 = arith.constant 0 : index
    %11 = vector.load %arg3[%c56, %c0_13] : memref<64x16xf32, #tpu.memory_space<vmem>>, vector<8x16xf32>
    %cst = arith.constant dense<0.000000e+00> : vector<1x256xf32>
    %12 = tpu.matmul %4, %3, %cst {dimension_numbers = #tpu.dot_dimension_numbers<[1], [0], [0], [1], [0, 0, 1, 1], [], []>} : vector<1x4xf32>, vector<4x256xf32>, vector<1x256xf32> -> vector<1x256xf32>
    %cst_14 = arith.constant dense<0.000000e+00> : vector<1x256xf32>
    %13 = tpu.matmul %4, %1, %cst_14 {dimension_numbers = #tpu.dot_dimension_numbers<[1], [0], [0], [1], [0, 0, 1, 1], [], []>} : vector<1x4xf32>, vector<4x256xf32>, vector<1x256xf32> -> vector<1x256xf32>
    %14 = tpu.concatenate %12, %13 in 0 : vector<1x256xf32>, vector<1x256xf32> -> vector<2x256xf32>
    %cst_15 = arith.constant dense<0xFF800000> : vector<2xf32>
    %15 = vector.multi_reduction <maximumf>, %14, %cst_15 [1] : vector<2x256xf32> to vector<2xf32>
    %16 = vector.shape_cast %15 : vector<2xf32> to vector<2x1xf32>
    %17 = vector.broadcast %16 : vector<2x1xf32> to vector<2x256xf32>
    %18 = arith.subf %14, %17 : vector<2x256xf32>
    %19 = math.exp %18 : vector<2x256xf32>
    %cst_16 = arith.constant dense<0.000000e+00> : vector<2xf32>
    %20 = vector.multi_reduction <add>, %19, %cst_16 [1] : vector<2x256xf32> to vector<2xf32>
    %21 = vector.shape_cast %20 : vector<2xf32> to vector<2x1xf32>
    %cst_17 = arith.constant 1.000000e+00 : f32
    %22 = vector.broadcast %cst_17 : f32 to vector<2x1xf32>
    %23 = arith.divf %22, %21 : vector<2x1xf32>
    %24 = vector.broadcast %23 : vector<2x1xf32> to vector<2x256xf32>
    %25 = arith.mulf %19, %24 : vector<2x256xf32>
    %26 = vector.extract_strided_slice %25 {offsets = [0, 0], sizes = [1, 256], strides = [1, 1]} : vector<2x256xf32> to vector<1x256xf32>
    %cst_18 = arith.constant dense<0.000000e+00> : vector<4x1xf32>
    %27 = tpu.matmul %1, %26, %cst_18 {dimension_numbers = #tpu.dot_dimension_numbers<[1], [1], [0], [0], [0, 0, 1, 0], [], []>} : vector<4x256xf32>, vector<1x256xf32>, vector<4x1xf32> -> vector<4x1xf32>
    %28 = vector.extract_strided_slice %25 {offsets = [1, 0], sizes = [1, 256], strides = [1, 1]} : vector<2x256xf32> to vector<1x256xf32>
    %cst_19 = arith.constant dense<0.000000e+00> : vector<4x1xf32>
    %29 = tpu.matmul %3, %28, %cst_19 {dimension_numbers = #tpu.dot_dimension_numbers<[1], [1], [0], [0], [0, 0, 1, 0], [], []>} : vector<4x256xf32>, vector<1x256xf32>, vector<4x1xf32> -> vector<4x1xf32>
    %30 = tpu.concatenate %27, %29 in 1 : vector<4x1xf32>, vector<4x1xf32> -> vector<4x2xf32>
    %cst_20 = arith.constant dense<0.000000e+00> : vector<4x2xf32>
    %31 = tpu.matmul %5, %30, %cst_20 {dimension_numbers = #tpu.dot_dimension_numbers<[1], [0], [0], [1], [0, 0, 1, 1], [], []>} : vector<4x4xf32>, vector<4x2xf32>, vector<4x2xf32> -> vector<4x2xf32>
    %32 = vector.broadcast %7 : vector<4x1xf32> to vector<4x2xf32>
    %33 = arith.addf %31, %32 : vector<4x2xf32>
    %cst_21 = arith.constant 0.000000e+00 : f32
    %34 = vector.broadcast %cst_21 : f32 to vector<4x2xf32>
    %35 = arith.maximumf %33, %34 : vector<4x2xf32>
    %36 = tpu.iota {dimensions = array<i32: 0>} : vector<4x2xi32>
    %37 = tpu.iota {dimensions = array<i32: 1>} : vector<4x2xi32>
    %c2_i32 = arith.constant 2 : i32
    %38 = vector.broadcast %c2_i32 : i32 to vector<4x2xi32>
    %39 = arith.cmpi slt, %36, %38 : vector<4x2xi32>
    %c0_i32 = arith.constant 0 : i32
    %40 = vector.broadcast %c0_i32 : i32 to vector<4x2xi32>
    %41 = arith.cmpi eq, %37, %40 : vector<4x2xi32>
    %42 = arith.xori %39, %41 : vector<4x2xi1>
    %cst_22 = arith.constant dense<true> : vector<4x2xi1>
    %43 = arith.xori %42, %cst_22 : vector<4x2xi1>
    %cst_23 = arith.constant 0.000000e+00 : f32
    %44 = vector.broadcast %cst_23 : f32 to vector<4x2xf32>
    %45 = arith.select %43, %35, %44 : vector<4x2xi1>, vector<4x2xf32>
    %cst_24 = arith.constant dense<0.000000e+00> : vector<4x2xf32>
    %46 = tpu.matmul %6, %45, %cst_24 {dimension_numbers = #tpu.dot_dimension_numbers<[1], [0], [0], [1], [0, 0, 1, 1], [], []>} : vector<4x4xf32>, vector<4x2xf32>, vector<4x2xf32> -> vector<4x2xf32>
    %47 = arith.addf %46, %8 : vector<4x2xf32>
    %48 = arith.negf %47 : vector<4x2xf32>
    %49 = math.exp %48 : vector<4x2xf32>
    %cst_25 = arith.constant 1.000000e+00 : f32
    %50 = vector.broadcast %cst_25 : f32 to vector<4x2xf32>
    %51 = arith.addf %50, %49 : vector<4x2xf32>
    %52 = arith.divf %50, %51 : vector<4x2xf32>
    %53 = vector.extract_strided_slice %52 {offsets = [0, 0], sizes = [4, 1], strides = [1, 1]} : vector<4x2xf32> to vector<4x1xf32>
    %54 = vector.extract_strided_slice %52 {offsets = [0, 1], sizes = [4, 1], strides = [1, 1]} : vector<4x2xf32> to vector<4x1xf32>
    %55 = vector.broadcast %53 : vector<4x1xf32> to vector<4x256xf32>
    %56 = arith.mulf %1, %55 : vector<4x256xf32>
    %57 = vector.broadcast %54 : vector<4x1xf32> to vector<4x256xf32>
    %58 = arith.mulf %3, %57 : vector<4x256xf32>
    %cst_26 = arith.constant dense<0.000000e+00> : vector<256xf32>
    %59 = vector.multi_reduction <add>, %56, %cst_26 [0] : vector<4x256xf32> to vector<256xf32>
    %60 = vector.shape_cast %59 : vector<256xf32> to vector<1x256xf32>
    %cst_27 = arith.constant dense<0.000000e+00> : vector<256xf32>
    %61 = vector.multi_reduction <add>, %58, %cst_27 [0] : vector<4x256xf32> to vector<256xf32>
    %62 = vector.shape_cast %61 : vector<256xf32> to vector<1x256xf32>
    %63 = arith.addf %60, %62 : vector<1x256xf32>
    %cst_28 = arith.constant 1.250000e-01 : f32
    %64 = vector.broadcast %cst_28 : f32 to vector<1x256xf32>
    %65 = arith.mulf %63, %64 : vector<1x256xf32>
    %cst_29 = arith.constant dense<0xFF800000> : vector<256xf32>
    %66 = vector.multi_reduction <maximumf>, %56, %cst_29 [0] : vector<4x256xf32> to vector<256xf32>
    %67 = vector.shape_cast %66 : vector<256xf32> to vector<1x256xf32>
    %cst_30 = arith.constant dense<0xFF800000> : vector<256xf32>
    %68 = vector.multi_reduction <maximumf>, %58, %cst_30 [0] : vector<4x256xf32> to vector<256xf32>
    %69 = vector.shape_cast %68 : vector<256xf32> to vector<1x256xf32>
    %70 = arith.maximumf %67, %69 : vector<1x256xf32>
    %71 = tpu.iota {dimensions = array<i32: 1>} : vector<1x256xi32>
    %c16_i32 = arith.constant 16 : i32
    %c0_i32_31 = arith.constant 0 : i32
    %72 = arith.cmpi eq, %c16_i32, %c0_i32_31 : i32
    %c1_i32 = arith.constant 1 : i32
    %73 = arith.select %72, %c1_i32, %c16_i32 : i32
    %74 = vector.broadcast %73 : i32 to vector<1x256xi32>
    %75 = arith.remsi %71, %74 : vector<1x256xi32>
    %c0_i32_32 = arith.constant 0 : i32
    %76 = vector.broadcast %c0_i32_32 : i32 to vector<1x256xi32>
    %77 = arith.cmpi ne, %75, %76 : vector<1x256xi32>
    %c0_i32_33 = arith.constant 0 : i32
    %78 = vector.broadcast %c0_i32_33 : i32 to vector<1x256xi32>
    %79 = arith.cmpi slt, %75, %78 : vector<1x256xi32>
    %c0_i32_34 = arith.constant 0 : i32
    %80 = arith.cmpi slt, %73, %c0_i32_34 : i32
    %81 = vector.broadcast %80 : i1 to vector<1x256xi1>
    %82 = vector.broadcast %81 : vector<1x256xi1> to vector<1x256xi1>
    %83 = arith.xori %79, %82 : vector<1x256xi1>
    %84 = arith.andi %83, %77 : vector<1x256xi1>
    %85 = vector.broadcast %73 : i32 to vector<1x256xi32>
    %86 = arith.addi %75, %85 : vector<1x256xi32>
    %87 = arith.select %84, %86, %75 : vector<1x256xi1>, vector<1x256xi32>
    %88 = tpu.iota {dimensions = array<i32: 1>} : vector<1x256xi32>
    %89 = tpu.concatenate %65, %70 in 0 : vector<1x256xf32>, vector<1x256xf32> -> vector<2x256xf32>
    %c3_i32 = arith.constant 3 : i32
    %90 = tpu.dynamic_rotate %89 by %c3_i32 dim 1 : vector<2x256xf32>, i32 -> vector<2x256xf32>
    %c3_i32_35 = arith.constant 3 : i32
    %91 = vector.broadcast %c3_i32_35 : i32 to vector<1x256xi32>
    %92 = arith.cmpi sge, %87, %91 : vector<1x256xi32>
    %cst_36 = arith.constant 0.000000e+00 : f32
    %93 = vector.shape_cast %92 : vector<1x256xi1> to vector<1x256xi1>
    %94 = vector.broadcast %93 : vector<1x256xi1> to vector<2x256xi1>
    %95 = vector.broadcast %cst_36 : f32 to vector<2x256xf32>
    %96 = arith.select %94, %90, %95 : vector<2x256xi1>, vector<2x256xf32>
    %c2_i32_37 = arith.constant 2 : i32
    %97 = tpu.dynamic_rotate %89 by %c2_i32_37 dim 1 : vector<2x256xf32>, i32 -> vector<2x256xf32>
    %c2_i32_38 = arith.constant 2 : i32
    %98 = vector.broadcast %c2_i32_38 : i32 to vector<1x256xi32>
    %99 = arith.cmpi sge, %87, %98 : vector<1x256xi32>
    %cst_39 = arith.constant 0.000000e+00 : f32
    %100 = vector.shape_cast %99 : vector<1x256xi1> to vector<1x256xi1>
    %101 = vector.broadcast %100 : vector<1x256xi1> to vector<2x256xi1>
    %102 = vector.broadcast %cst_39 : f32 to vector<2x256xf32>
    %103 = arith.select %101, %97, %102 : vector<2x256xi1>, vector<2x256xf32>
    %c1_i32_40 = arith.constant 1 : i32
    %104 = tpu.dynamic_rotate %89 by %c1_i32_40 dim 1 : vector<2x256xf32>, i32 -> vector<2x256xf32>
    %c1_i32_41 = arith.constant 1 : i32
    %105 = vector.broadcast %c1_i32_41 : i32 to vector<1x256xi32>
    %106 = arith.cmpi sge, %87, %105 : vector<1x256xi32>
    %cst_42 = arith.constant 0.000000e+00 : f32
    %107 = vector.shape_cast %106 : vector<1x256xi1> to vector<1x256xi1>
    %108 = vector.broadcast %107 : vector<1x256xi1> to vector<2x256xi1>
    %109 = vector.broadcast %cst_42 : f32 to vector<2x256xf32>
    %110 = arith.select %108, %104, %109 : vector<2x256xi1>, vector<2x256xf32>
    %c255_i32 = arith.constant 255 : i32
    %111 = tpu.dynamic_rotate %89 by %c255_i32 dim 1 : vector<2x256xf32>, i32 -> vector<2x256xf32>
    %c15_i32 = arith.constant 15 : i32
    %112 = vector.broadcast %c15_i32 : i32 to vector<1x256xi32>
    %113 = arith.cmpi slt, %87, %112 : vector<1x256xi32>
    %cst_43 = arith.constant 0.000000e+00 : f32
    %114 = vector.shape_cast %113 : vector<1x256xi1> to vector<1x256xi1>
    %115 = vector.broadcast %114 : vector<1x256xi1> to vector<2x256xi1>
    %116 = vector.broadcast %cst_43 : f32 to vector<2x256xf32>
    %117 = arith.select %115, %111, %116 : vector<2x256xi1>, vector<2x256xf32>
    %c254_i32 = arith.constant 254 : i32
    %118 = tpu.dynamic_rotate %89 by %c254_i32 dim 1 : vector<2x256xf32>, i32 -> vector<2x256xf32>
    %c14_i32 = arith.constant 14 : i32
    %119 = vector.broadcast %c14_i32 : i32 to vector<1x256xi32>
    %120 = arith.cmpi slt, %87, %119 : vector<1x256xi32>
    %cst_44 = arith.constant 0.000000e+00 : f32
    %121 = vector.shape_cast %120 : vector<1x256xi1> to vector<1x256xi1>
    %122 = vector.broadcast %121 : vector<1x256xi1> to vector<2x256xi1>
    %123 = vector.broadcast %cst_44 : f32 to vector<2x256xf32>
    %124 = arith.select %122, %118, %123 : vector<2x256xi1>, vector<2x256xf32>
    %c253_i32 = arith.constant 253 : i32
    %125 = tpu.dynamic_rotate %89 by %c253_i32 dim 1 : vector<2x256xf32>, i32 -> vector<2x256xf32>
    %c13_i32 = arith.constant 13 : i32
    %126 = vector.broadcast %c13_i32 : i32 to vector<1x256xi32>
    %127 = arith.cmpi slt, %87, %126 : vector<1x256xi32>
    %cst_45 = arith.constant 0.000000e+00 : f32
    %128 = vector.shape_cast %127 : vector<1x256xi1> to vector<1x256xi1>
    %129 = vector.broadcast %128 : vector<1x256xi1> to vector<2x256xi1>
    %130 = vector.broadcast %cst_45 : f32 to vector<2x256xf32>
    %131 = arith.select %129, %125, %130 : vector<2x256xi1>, vector<2x256xf32>
    %cst_46 = arith.constant 0.000000e+00 : f32
    %132 = vector.broadcast %cst_46 : f32 to vector<2x256xf32>
    %133 = tpu.concatenate %96, %103, %110, %89, %117, %124, %131, %132 in 0 : vector<2x256xf32>, vector<2x256xf32>, vector<2x256xf32>, vector<2x256xf32>, vector<2x256xf32>, vector<2x256xf32>, vector<2x256xf32>, vector<2x256xf32> -> vector<16x256xf32>
    %cst_47 = arith.constant dense<0.000000e+00> : vector<8x256xf32>
    %134 = tpu.matmul %11, %133, %cst_47 {dimension_numbers = #tpu.dot_dimension_numbers<[1], [0], [0], [1], [0, 0, 1, 1], [], []>} : vector<8x16xf32>, vector<16x256xf32>, vector<8x256xf32> -> vector<8x256xf32>
    %135 = vector.extract_strided_slice %134 {offsets = [0, 0], sizes = [1, 256], strides = [1, 1]} : vector<8x256xf32> to vector<1x256xf32>
    %c48_i32 = arith.constant 48 : i32
    %136 = tpu.dynamic_rotate %135 by %c48_i32 dim 1 : vector<1x256xf32>, i32 -> vector<1x256xf32>
    %c48_i32_48 = arith.constant 48 : i32
    %137 = vector.broadcast %c48_i32_48 : i32 to vector<1x256xi32>
    %138 = arith.cmpi sge, %88, %137 : vector<1x256xi32>
    %cst_49 = arith.constant 0.000000e+00 : f32
    %139 = vector.broadcast %cst_49 : f32 to vector<1x256xf32>
    %140 = arith.select %138, %136, %139 : vector<1x256xi1>, vector<1x256xf32>
    %141 = vector.extract_strided_slice %134 {offsets = [1, 0], sizes = [1, 256], strides = [1, 1]} : vector<8x256xf32> to vector<1x256xf32>
    %c32_i32 = arith.constant 32 : i32
    %142 = tpu.dynamic_rotate %141 by %c32_i32 dim 1 : vector<1x256xf32>, i32 -> vector<1x256xf32>
    %c32_i32_50 = arith.constant 32 : i32
    %143 = vector.broadcast %c32_i32_50 : i32 to vector<1x256xi32>
    %144 = arith.cmpi sge, %88, %143 : vector<1x256xi32>
    %cst_51 = arith.constant 0.000000e+00 : f32
    %145 = vector.broadcast %cst_51 : f32 to vector<1x256xf32>
    %146 = arith.select %144, %142, %145 : vector<1x256xi1>, vector<1x256xf32>
    %147 = vector.extract_strided_slice %134 {offsets = [2, 0], sizes = [1, 256], strides = [1, 1]} : vector<8x256xf32> to vector<1x256xf32>
    %c16_i32_52 = arith.constant 16 : i32
    %148 = tpu.dynamic_rotate %147 by %c16_i32_52 dim 1 : vector<1x256xf32>, i32 -> vector<1x256xf32>
    %c16_i32_53 = arith.constant 16 : i32
    %149 = vector.broadcast %c16_i32_53 : i32 to vector<1x256xi32>
    %150 = arith.cmpi sge, %88, %149 : vector<1x256xi32>
    %cst_54 = arith.constant 0.000000e+00 : f32
    %151 = vector.broadcast %cst_54 : f32 to vector<1x256xf32>
    %152 = arith.select %150, %148, %151 : vector<1x256xi1>, vector<1x256xf32>
    %153 = vector.extract_strided_slice %134 {offsets = [3, 0], sizes = [1, 256], strides = [1, 1]} : vector<8x256xf32> to vector<1x256xf32>
    %154 = vector.extract_strided_slice %134 {offsets = [4, 0], sizes = [1, 256], strides = [1, 1]} : vector<8x256xf32> to vector<1x256xf32>
    %c240_i32 = arith.constant 240 : i32
    %155 = tpu.dynamic_rotate %154 by %c240_i32 dim 1 : vector<1x256xf32>, i32 -> vector<1x256xf32>
    %c240_i32_55 = arith.constant 240 : i32
    %156 = vector.broadcast %c240_i32_55 : i32 to vector<1x256xi32>
    %157 = arith.cmpi slt, %88, %156 : vector<1x256xi32>
    %cst_56 = arith.constant 0.000000e+00 : f32
    %158 = vector.broadcast %cst_56 : f32 to vector<1x256xf32>
    %159 = arith.select %157, %155, %158 : vector<1x256xi1>, vector<1x256xf32>
    %160 = vector.extract_strided_slice %134 {offsets = [5, 0], sizes = [1, 256], strides = [1, 1]} : vector<8x256xf32> to vector<1x256xf32>
    %c224_i32 = arith.constant 224 : i32
    %161 = tpu.dynamic_rotate %160 by %c224_i32 dim 1 : vector<1x256xf32>, i32 -> vector<1x256xf32>
    %c224_i32_57 = arith.constant 224 : i32
    %162 = vector.broadcast %c224_i32_57 : i32 to vector<1x256xi32>
    %163 = arith.cmpi slt, %88, %162 : vector<1x256xi32>
    %cst_58 = arith.constant 0.000000e+00 : f32
    %164 = vector.broadcast %cst_58 : f32 to vector<1x256xf32>
    %165 = arith.select %163, %161, %164 : vector<1x256xi1>, vector<1x256xf32>
    %166 = vector.extract_strided_slice %134 {offsets = [6, 0], sizes = [1, 256], strides = [1, 1]} : vector<8x256xf32> to vector<1x256xf32>
    %c208_i32 = arith.constant 208 : i32
    %167 = tpu.dynamic_rotate %166 by %c208_i32 dim 1 : vector<1x256xf32>, i32 -> vector<1x256xf32>
    %c208_i32_59 = arith.constant 208 : i32
    %168 = vector.broadcast %c208_i32_59 : i32 to vector<1x256xi32>
    %169 = arith.cmpi slt, %88, %168 : vector<1x256xi32>
    %cst_60 = arith.constant 0.000000e+00 : f32
    %170 = vector.broadcast %cst_60 : f32 to vector<1x256xf32>
    %171 = arith.select %169, %167, %170 : vector<1x256xi1>, vector<1x256xf32>
    %172 = arith.addf %140, %146 : vector<1x256xf32>
    %173 = arith.addf %152, %153 : vector<1x256xf32>
    %174 = arith.addf %159, %165 : vector<1x256xf32>
    %175 = arith.addf %172, %173 : vector<1x256xf32>
    %176 = arith.addf %174, %171 : vector<1x256xf32>
    %177 = arith.addf %175, %176 : vector<1x256xf32>
    %178 = arith.negf %177 : vector<1x256xf32>
    %179 = math.exp %178 : vector<1x256xf32>
    %cst_61 = arith.constant 1.000000e+00 : f32
    %180 = vector.broadcast %cst_61 : f32 to vector<1x256xf32>
    %181 = arith.addf %180, %179 : vector<1x256xf32>
    %182 = arith.divf %180, %181 : vector<1x256xf32>
    %cst_62 = arith.constant dense<0.000000e+00> : vector<4x256xf32>
    %183 = tpu.matmul %9, %56, %cst_62 {dimension_numbers = #tpu.dot_dimension_numbers<[1], [0], [0], [1], [0, 0, 1, 1], [], []>} : vector<4x4xf32>, vector<4x256xf32>, vector<4x256xf32> -> vector<4x256xf32>
    %cst_63 = arith.constant dense<0.000000e+00> : vector<4x256xf32>
    %184 = tpu.matmul %10, %58, %cst_63 {dimension_numbers = #tpu.dot_dimension_numbers<[1], [0], [0], [1], [0, 0, 1, 1], [], []>} : vector<4x4xf32>, vector<4x256xf32>, vector<4x256xf32> -> vector<4x256xf32>
    %185 = arith.addf %183, %184 : vector<4x256xf32>
    %186 = vector.broadcast %182 : vector<1x256xf32> to vector<4x256xf32>
    %187 = arith.mulf %185, %186 : vector<4x256xf32>
    %c0_64 = arith.constant 0 : index
    %c0_65 = arith.constant 0 : index
    %c0_66 = arith.constant 0 : index
    %188 = vector.load %arg4[%c0_64, %c0_65, %c0_66] : memref<1x4x256xf32, #tpu.memory_space<vmem>>, vector<1x4x256xf32>
    %189 = vector.shape_cast %188 : vector<1x4x256xf32> to vector<4x256xf32>
    %190 = vector.shape_cast %187 : vector<4x256xf32> to vector<1x4x256xf32>
    tpu.vector_store %arg4[%c0_64, %c0_65, %c0_66], %190 {strides = array<i32>} : memref<1x4x256xf32, #tpu.memory_space<vmem>>, vector<1x4x256xf32>,
    return
  }
  func.func @transform_0(%arg0: i32) -> (i32, i32, i32) {
    %c0_i32 = arith.constant 0 : i32
    %c0_i32_0 = arith.constant 0 : i32
    %c0_i32_1 = arith.constant 0 : i32
    return %arg0, %c0_i32, %c0_i32_0 : i32, i32, i32
  }
  func.func @transform_1(%arg0: i32) -> (i32, i32, i32) {
    %c0_i32 = arith.constant 0 : i32
    %c0_i32_0 = arith.constant 0 : i32
    %c0_i32_1 = arith.constant 0 : i32
    return %arg0, %c0_i32, %c0_i32_0 : i32, i32, i32
  }
  func.func @transform_2(%arg0: i32) -> (i32, i32) {
    %c0_i32 = arith.constant 0 : i32
    %c0_i32_0 = arith.constant 0 : i32
    %c0_i32_1 = arith.constant 0 : i32
    return %c0_i32, %c0_i32_0 : i32, i32
  }
  func.func @transform_3(%arg0: i32) -> (i32, i32, i32) {
    %c0_i32 = arith.constant 0 : i32
    %c0_i32_0 = arith.constant 0 : i32
    %c0_i32_1 = arith.constant 0 : i32
    return %arg0, %c0_i32, %c0_i32_0 : i32, i32, i32
  }
}

</mosaic_0001>

<bundles_post_ra>
// kernel: tpu_custom_call.1
= control target key start
LH: loop header
LB: loop body
LE: loop exit
PB: predicated region body
PF: predicated region fallthrough
CT: control target
= control target key end

     0   :  { %8 = vsyncpa [#allocation3], 0  ;;  %s1888_s0 = inlined_call_operand.vmem [shape: f32[2,4,256], index: 0, kind: input, shape index: {}]   ;;  %s1889_s1 = inlined_call_operand.vmem [shape: f32[2,4,256], index: 1, kind: input, shape index: {}]   ;;  %s1890_s2 = inlined_call_operand.vmem [shape: f32[64,16], index: 2, kind: input, shape index: {}]   ;;  %s1891_s3 = inlined_call_operand.hbm [shape: f32[2,4,256], index: 3, kind: output, shape index: {}]  }
   0x1   :  { %10 = vsyncpa [#allocation3 + $0x1], 0  ;;  %s1541_s12 = smov 0   ;;  %s1543_s13 = smov 0  }
   0x2   :  { %s1545_s14 = smov 0   ;;  %s1547_s15 = smov 0  }
   0x3 LB: > { %s1562_s16 = sadd.s32 4294967295, %s1500_s15   ;;  %s1306_s17 = sadd.s32 4294967294, %s1500_s15   ;;  %s1500_s15 = sphi %s1547_s15, %s1906_s15   ;;  %s1496_s14 = sphi %s1545_s14, %s1905_s14   ;;  %s1492_s13 = sphi %s1543_s13, %s1904_s13   ;;  %s1488_s12 = sphi %s1541_s12, %s1903_s12  }
   0x4   : > { %s1566_s18 = sadd.s32 1, %s1500_s15   ;;  %s96_s19 = sadd.s32 1, %s1496_s14 }
   0x5   : > { %s93_s20 = ssub.s32 %s1500_s15, %s1566_s18  ;;  %p106_p0 = scmp.ne.s32.totalorder %s1496_s14, %s1492_s13 }
   0x6   : > { %p94_p1 = scmp.eq.s32.totalorder %s93_s20, 0  ;;  %p107_p2 = scmp.eq.s32.totalorder %s1562_s16, 1 }
   0x7   : > { %p112_p3 = scmp.ne.s32.totalorder %s1492_s13, %s1488_s12  ;;  %p113_p4 = scmp.eq.s32.totalorder %s1306_s17, 1 }
   0x8   : > { %s1577_s21 = scalar_select %p94_p1, %s1496_s14, %s96_s19  }
   0x9   : > { %p1579_p5 = por %p107_p2, %p106_p0  ;;  %p1583_p6 = por %p113_p4, %p112_p3 }
   0xa   : > { %p1309_p7 = scmp.ge.s32.totalorder %s1500_s15, 1  ;;  %p150_p8 = scmp.lt.s32.totalorder %s1500_s15, 3 }
   0xc   : > { %p151_p9 = pnand %p1309_p7, %p150_p8 }
   0xd   : > { %p179_p10 = scmp.lt.s32.totalorder (!%p151_p9), %s1562_s16, 1  ;;  %s1510_s26 = smov (!%p151_p9), 127  }
   0xe   : > { %154 = sbr.rel (%p151_p9) target bundleno = 1817 (0x719), region = 32  ;;  %s1511_s27 = smov (!%p151_p9), 2  }
   0xf   : > { %s1513_s29 = smov (!%p151_p9), 125   ;;  %s1514_s9 = smov (!%p151_p9), 48  }
  0x10   : > { %s1515_s10 = smov (!%p151_p9), 32   ;;  %s1516_s11 = smov (!%p151_p9), 16  }
  0x11   : > { %s1517_s17 = smov (!%p151_p9), 112   ;;  %s1518_s19 = smov (!%p151_p9), 96  }
  0x12   : > { %s1519_s20 = smov (!%p151_p9), 80   ;;  %s1520_s7 = smov (!%p151_p9), [#allocation2]  }
  0x13   : > { %v1502_v0 = vmov 0.0   ;;  %s180_s24 = scalar_select %p179_p10, %s1562_s16, 1  ;;  %vm1893_vm0 = vcmask 1043456   ;;  %v191_v5 = vld [vmem:[%s1890_s2] sm:$0x1]  ;;  %vm1892_vm1 = vcmask 31744   ;;  %v388_v28 = vlaneseq }
  0x14   : > { %274 = vmatprep.mubr.f32.mxu0 %v1502_v0  ;;  %351 = vmatprep.mubr.f32.mxu1 %v1502_v0  ;;  %vm364_vm2 = vcmask 1040384   ;;  %vm367_vm3 = vcmask 1041408   ;;  %vm1503_vm4 = vmmov 0   ;;  %v194_v51 = vld [vmem:[%s1890_s2 + $0x18] sm:$0xf]  ;;  %v1504_v52 = vmov 0  }
  0x15   : > { %s1342_s25 = sshll.u32 %s180_s24, 3  ;;  %v1626_v29 = vshrl.u32 %v388_v28, 7  ;;  %1416 = vset.pattern.permute.xlu0 %v1504_v52  ;;  %1417 = vset.pattern.permute.xlu1 %v1504_v52  ;;  %vm430_vm5 = vcmask 7168   ;;  %v192_v55 = vld [vmem:[%s1890_s2 + $0x8] sm:$0xf]  ;;  %v1651_v57 = vand.u32 127, %v388_v28 }
  0x16   : > { %s188_s28 = scalar_lea.vmem %s1889_s1, %s1342_s25  ;;  %s183_s4 = scalar_lea.vmem %s1888_s0, %s1342_s25  ;;  %vm1505_vm9 = vmmov 1   ;;  %v193_v63 = vld [vmem:[%s1890_s2 + $0x10] sm:$0xf] }
  0x17   : > { %v1599_v1 = vld [vmem:[%s188_s28] sm:$0xff]  ;;  %v1629_v30 = vsub.s32 0, %v1626_v29  ;;  %v411_v31 = vsub.s32 1, %v1626_v29  ;;  %vm518_vm6 = vcmp.lt.s32.totalorder %v1626_v29, 2  ;;  %vm519_vm7 = vcmp.eq.s32.totalorder %v1651_v57, 0  ;;  %s1508_s24 = smov 1  }
  0x18   : > { %v1601_v2 = vld [vmem:[%s183_s4] sm:$0xff]  ;;  %v200_v3 = vcombine.high %v1599_v1, %v1599_v1  ;;  %vm520_vm8 = vmxor %vm518_vm6, %vm519_vm7  ;;  %s1509_s25 = smov 126   ;;  %s1512_s28 = smov 3   ;;  %vm789_vm11 = vcmp.lt.s32.totalorder %v1651_v57, 126  ;;  %vm744_vm14 = vcmp.lt.s32.totalorder %v1651_v57, 2  ;;  %vm804_vm15 = vcmp.lt.s32.totalorder %v1651_v57, 125 }
  0x19   : > { %v282_v4 = vcombine.high %v1601_v2, %v1601_v2  ;;  %vm521_vm10 = vmxor %vm520_vm8, %vm1505_vm9  ;;  %vm759_vm7 = vcmp.lt.s32.totalorder %v1651_v57, 1  ;;  %s1444_s8 = sshll.u32 %s1520_s7, 4  ;;  %s1445_s8 = int_to_ptr.vmem [resolvable:$false] %s1444_s8 }
  0x1a   : > { %1315 = vmatprep.subr.msk.mxu0 %vm1893_vm0, %v200_v3 }
  0x1b   : > { %1318 = vmatprep.subr.msk.mxu1 %vm1893_vm0, %v282_v4  ;;  %1316 = vmatpush1.msk.msra.mxu0 %vm1893_vm0, %v1599_v1  ;;  %v1506_v4 = vmov 1  }
  0x1c   : > { %1319 = vmatpush1.msk.msra.mxu1 %vm1893_vm0, %v1601_v2  ;;  %1317 = vmatmul.mubr.msk.f32.vlgmr.msra.gmra.mxu0 %vm1892_vm1, %v191_v5 }
  0x1d   : > { %1320 = vmatmul.mubr.msk.f32.vlgmr.msra.gmra.mxu1 %vm1892_vm1, %v191_v5  ;;  %1349 = vmatprep.subr.mxu0 %v1502_v0  ;;  %v195_v5 = vld [vmem:[%s1890_s2 + $0x20] sm:$0xf] }
  0x1e   : > { %1354 = vmatprep.subr.mxu1 %v1502_v0  ;;  %1351 = vmatprep.mubr.msk.f32.mxu0 %vm1503_vm4, %v1502_v0 }
  0x1f   : > { %1356 = vmatprep.mubr.msk.f32.mxu1 %vm1503_vm4, %v1502_v0 }
  0xdc   : > { %v276_v6 = vpop.f32.mrf.mxu0 }
  0xdd   : > { %v353_v7 = vpop.f32.mrf.mxu1 }
  0xde   : > { %v360_v8 = vrot.slane %v353_v7, 7  ;;  %v278_v12 = vpop.f32.mrf.mxu0 }
  0xdf   : > { %v355_v9 = vpop.f32.mrf.mxu1 }
  0xe0   : > { %v361_v10 = vrot.slane %v355_v9, 7  ;;  %v365_v11 = vsel %vm364_vm2, %v276_v6, %v360_v8 }
  0xe1   : > { %v368_v14 = vsel %vm367_vm3, %v365_v11, -inf }
  0xe2   : > { %v366_v13 = vsel %vm364_vm2, %v278_v12, %v361_v10 }
  0xe3   : > { %v369_v15 = vsel %vm367_vm3, %v366_v13, -inf }
  0xe4   : > { %v370_v16 = vmax.f32 %v368_v14, %v369_v15 }
  0xe6   : > { %371 = vmax.xlane.f32.xlu0 %v370_v16 }
 0x16f   : > { %v372_v17 = vpop.xlane.xlu0 %371 }
 0x170   : > { %v373_v18 = vsub.f32 %v365_v11, %v372_v17  ;;  %v374_v19 = vsub.f32 %v366_v13, %v372_v17  ;;  %v1507_v13 = vmov 839922192  }
 0x171   : > { %v610_v14 = vunpack.c.l.s4 %v1507_v13 }
 0x172   : > { %v375_v20 = vmul.f32 1.442695, %v373_v18  ;;  %v377_v21 = vmul.f32 1.442695, %v374_v19 }
 0x173   : > { %v611_v15 = vunpack.c.0.s8 %v610_v14 }
 0x174   : > { %1422 = vpow2.f32 %v375_v20 }
 0x175   : > { %1424 = vpow2.f32 %v377_v21  ;;  %v614_v16 = vsub.s32 %v611_v15, %v1626_v29 }
 0x181   : > { %v1423_v22 = vpop.eup %1422 }
 0x182   : > { %v1425_v23 = vpop.eup %1424  ;;  %v379_v24 = vsel %vm367_vm3, %v1423_v22, 0.0 }
 0x183   : > { %v380_v25 = vsel %vm367_vm3, %v1425_v23, 0.0 }
 0x184   : > { %v381_v26 = vadd.f32 %v380_v25, %v379_v24 }
 0x186   : > { %382 = vadd.xlane.f32.xlu0 %v381_v26 }
 0x19c   : > { %434 = vperm.xlu0 %1416, %v194_v51  }
 0x1a0   : > { %1419 = vset.pattern.permute.xlu0 %v1506_v4 }
 0x20f   : > { %v383_v27 = vpop.xlane.xlu0 %382 }
 0x210   : > { %1426 = vrcp.f32 %v383_v27 }
 0x217   : > { %v435_v58 = vpop.permute.xlu0 %434 }
 0x21d   : > { %v1427_v32 = vpop.eup %1426 }
 0x21e   : > { %v386_v33 = vmul.f32 %v1427_v32, %v1423_v22  ;;  %v387_v34 = vmul.f32 %v1427_v32, %v1425_v23 }
 0x220   : > { %v391_v35 = vrot.slane %v386_v33, %v1629_v30  ;;  %v395_v36 = vrot.slane %v387_v34, %v1629_v30  ;;  %v412_v37 = vrot.slane %v386_v33, %v411_v31  ;;  %v416_v38 = vrot.slane %v387_v34, %v411_v31 }
 0x222   : > { %v398_v39 = vcombine.low %v391_v35, %v395_v36  ;;  %v419_v40 = vcombine.low %v412_v37, %v416_v38 }
 0x224   : > { %v400_v41 = vmul.f32 %v398_v39, %v1601_v2  ;;  %v421_v42 = vmul.f32 %v419_v40, %v1599_v1 }
 0x226   : > { %v402_v43 = vcombine.high %v400_v41, %v400_v41  ;;  %v423_v44 = vcombine.high %v421_v42, %v421_v42  ;;  %v404_v45 = vsel %vm1893_vm0, %v400_v41, 0.0  ;;  %v425_v49 = vsel %vm1893_vm0, %v421_v42, 0.0 }
 0x228   : > { %v405_v46 = vsel %vm1893_vm0, %v402_v43, 0.0  ;;  %v426_v48 = vsel %vm1893_vm0, %v423_v44, 0.0 }
 0x229   : > { %v406_v47 = vadd.f32 %v405_v46, %v404_v45  ;;  %v427_v50 = vadd.f32 %v426_v48, %v425_v49 }
 0x22b   : > { %407 = vadd.xlane.f32.xlu1 %v406_v47 }
 0x22f   : > { %428 = vadd.xlane.f32.xlu1 %v427_v50 }
 0x2b4   : > { %v408_v53 = vpop.xlane.xlu1 %407 }
 0x2b8   : > { %v429_v54 = vpop.xlane.xlu1 %428 }
 0x2b9   : > { %v431_v56 = vsel %vm430_vm5, %v408_v53, %v429_v54 }
 0x2ba   : > { %1350 = vmatpush3.msk.msra.mxu0 %vm1893_vm0, %v431_v56 }
 0x2bb   : > { %1352 = vmatmul.mubr.msk.f32.vlgmr.msra.gmra.mxu0 %vm1892_vm1, %v192_v55 }
 0x2bc   : > { %926 = vmatprep.mubr.f32.mxu0 %v1502_v0 }
 0x37b   : > { %v509_v59 = vpop.f32.mrf.mxu0 }
 0x37c   : > { %v510_v60 = vadd.f32 %v509_v59, %v435_v58 }
 0x37d   : > { %v1353_v61 = vpop.f32.mrf.mxu0 }
 0x37e   : > { %v513_v62 = vmax.f32 %v510_v60, 0.0 }
 0x380   : > { %v522_v3 = vsel %vm521_vm10, %v513_v62, 0.0  ;;  %vm774_vm10 = vcmp.lt.s32.totalorder %v1651_v57, 127 }
 0x381   : > { %1355 = vmatpush3.msk.msra.mxu1 %vm1893_vm0, %v522_v3 }
 0x382   : > { %1357 = vmatmul.mubr.msk.f32.vlgmr.msra.gmra.mxu1 %vm1892_vm1, %v193_v63 }
 0x383   : > { %1120 = vmatprep.mubr.f32.mxu1 %v1502_v0 }
 0x442   : > { %v595_v6 = vpop.f32.mrf.mxu1 }
 0x443   : > { %v596_v7 = vadd.f32 %v595_v6, %v195_v5 }
 0x444   : > { %v1358_v8 = vpop.f32.mrf.mxu1 }
 0x445   : > { %v1325_v9 = vmul.f32 -1.442695, %v596_v7 }
 0x447   : > { %1428 = vpow2.f32 %v1325_v9 }
 0x454   : > { %v1429_v10 = vpop.eup %1428 }
 0x455   : > { %v602_v11 = vadd.f32 1.0, %v1429_v10 }
 0x457   : > { %1430 = vrcp.f32 %v602_v11 }
 0x464   : > { %v1431_v12 = vpop.eup %1430 }
 0x465   : > { %607 = vperm.xlu1 %1417, %v1431_v12  }
 0x469   : > { %1418 = vset.pattern.permute.xlu1 %v1506_v4 }
 0x46a   : > { %619 = vperm.xlu1 %1418, %v1431_v12  }
 0x4e0   : > { %v608_v17 = vpop.permute.xlu1 %607 }
 0x4e1   : > { %v615_v18 = vrot.slane %v608_v17, %v614_v16 }
 0x4e3   : > { %v1666_v19 = vmul.f32 %v615_v18, %v1601_v2 }
 0x4e5   : > { %v1670_v20 = vcombine.high %v1666_v19, %v1666_v19  ;;  %v633_v21 = vsel %vm1893_vm0, %v1666_v19, 0.0  ;;  %v668_v22 = vsel %vm1893_vm0, %v1666_v19, -inf  ;;  %v620_v23 = vpop.permute.xlu1 %619 }
 0x4e6   : > { %v634_v24 = vrot.slane %v633_v21, 4  ;;  %v669_v25 = vrot.slane %v668_v22, 4  ;;  %v627_v26 = vrot.slane %v620_v23, %v614_v16 }
 0x4e7   : > { %v640_v27 = vsel %vm1893_vm0, %v1670_v20, 0.0  ;;  %v675_v37 = vsel %vm1893_vm0, %v1670_v20, -inf }
 0x4e8   : > { %v635_v28 = vadd.f32 %v634_v24, %v633_v21  ;;  %v670_v2 = vmax.f32 %v668_v22, %v669_v25  ;;  %v629_v29 = vmul.f32 %v627_v26, %v1599_v1  ;;  %v641_v32 = vrot.slane %v640_v27, 4 }
 0x4e9   : > { %v676_v47 = vrot.slane %v675_v37, 4 }
 0x4ea   : > { %v636_v31 = vrot.slane %v635_v28, 2  ;;  %v650_v33 = vsel %vm1893_vm0, %v629_v29, 0.0  ;;  %v682_v34 = vsel %vm1893_vm0, %v629_v29, -inf  ;;  %v648_v35 = vcombine.high %v629_v29, %v629_v29 }
 0x4eb   : > { %v671_v36 = vrot.slane %v670_v2, 2  ;;  %v651_v38 = vrot.slane %v650_v33, 4  ;;  %v683_v39 = vrot.slane %v682_v34, 4  ;;  %v642_v42 = vadd.f32 %v641_v32, %v640_v27 }
 0x4ec   : > { %v657_v40 = vsel %vm1893_vm0, %v648_v35, 0.0  ;;  %v689_v41 = vsel %vm1893_vm0, %v648_v35, -inf  ;;  %1331 = vmatprep.subr.msk.mxu1 %vm1893_vm0, %v648_v35  ;;  %v637_v1 = vadd.f32 %v636_v31, %v635_v28  ;;  %v677_v59 = vmax.f32 %v675_v37, %v676_v47 }
 0x4ed   : > { %1332 = vmatpush1.msk.msra.mxu1 %vm1893_vm0, %v629_v29  ;;  %v652_v43 = vadd.f32 %v651_v38, %v650_v33  ;;  %v684_v44 = vmax.f32 %v682_v34, %v683_v39  ;;  %v658_v45 = vrot.slane %v657_v40, 4  ;;  %v690_v46 = vrot.slane %v689_v41, 4  ;;  %v197_v29 = vld [vmem:[%s1890_s2 + $0x30] sm:$0xf] }
 0x4ee   : > { %v672_v48 = vmax.f32 %v670_v2, %v671_v36  ;;  %v638_v52 = vrot.slane %v637_v1, 1  ;;  %v643_v53 = vrot.slane %v642_v42, 2  ;;  %v678_v9 = vrot.slane %v677_v59, 2  ;;  %1333 = vmatmul.mubr.msk.f32.vlgmr.msra.gmra.mxu1 %vm1892_vm1, %v197_v29 }
 0x4ef   : > { %v653_v49 = vrot.slane %v652_v43, 2  ;;  %v685_v50 = vrot.slane %v684_v44, 2  ;;  %v659_v51 = vadd.f32 %v658_v45, %v657_v40  ;;  %v691_v58 = vmax.f32 %v689_v41, %v690_v46 }
 0x4f0   : > { %v673_v60 = vrot.slane %v672_v48, 1  ;;  %v644_v3 = vadd.f32 %v643_v53, %v642_v42  ;;  %v639_v4 = vadd.f32 %v638_v52, %v637_v1  ;;  %v679_v16 = vmax.f32 %v677_v59, %v678_v9 }
 0x4f1   : > { %v654_v54 = vadd.f32 %v653_v49, %v652_v43  ;;  %v686_v55 = vmax.f32 %v684_v44, %v685_v50  ;;  %v660_v56 = vrot.slane %v659_v51, 2  ;;  %v692_v7 = vrot.slane %v691_v58, 2 }
 0x4f2   : > { %v674_v8 = vmax.f32 %v672_v48, %v673_v60  ;;  %v645_v12 = vrot.slane %v644_v3, 1  ;;  %v680_v23 = vrot.slane %v679_v16, 1  ;;  %v1710_v35 = vadd.s32 128, %v1651_v57 }
 0x4f3   : > { %v655_v61 = vrot.slane %v654_v54, 1  ;;  %v687_v62 = vrot.slane %v686_v55, 1  ;;  %v661_v63 = vadd.f32 %v660_v56, %v659_v51  ;;  %v693_v13 = vmax.f32 %v691_v58, %v692_v7 }
 0x4f4   : > { %v646_v22 = vadd.f32 %v645_v12, %v644_v3  ;;  %v681_v27 = vmax.f32 %v679_v16, %v680_v23  ;;  %v1713_v37 = vand.u32 15, %v1651_v57  ;;  %v1716_v38 = vand.u32 15, %v1710_v35 }
 0x4f5   : > { %v656_v5 = vadd.f32 %v655_v61, %v654_v54  ;;  %v688_v6 = vmax.f32 %v686_v55, %v687_v62  ;;  %v662_v10 = vrot.slane %v661_v63, 1  ;;  %v694_v21 = vrot.slane %v693_v13, 1 }
 0x4f6   : > { %vm792_vm12 = vcmp.lt.s32.totalorder %v1713_v37, 14  ;;  %vm793_vm13 = vcmp.lt.s32.totalorder %v1716_v38, 14  ;;  %vm748_vm4 = vcmp.ge.s32.totalorder %v1716_v38, 2  ;;  %vm807_vm5 = vcmp.lt.s32.totalorder %v1713_v37, 13 }
 0x4f7   : > { %v664_v11 = vadd.f32 %v656_v5, %v639_v4  ;;  %v696_v15 = vmax.f32 %v674_v8, %v688_v6  ;;  %v663_v17 = vadd.f32 %v662_v10, %v661_v63  ;;  %v695_v25 = vmax.f32 %v693_v13, %v694_v21 }
 0x4f8   : > { %vm808_vm6 = vcmp.lt.s32.totalorder %v1716_v38, 13  ;;  %vm762_vm8 = vcmp.ge.s32.totalorder %v1713_v37, 1  ;;  %vm763_vm9 = vcmp.ge.s32.totalorder %v1716_v38, 1  ;;  %vm778_vm1 = vcmp.lt.s32.totalorder %v1716_v38, 15 }
 0x4f9   : > { %v666_v14 = vmul.f32 0.125, %v664_v11  ;;  %v665_v24 = vadd.f32 %v663_v17, %v646_v22  ;;  %v697_v28 = vmax.f32 %v681_v27, %v695_v25  ;;  %vm732_vm0 = vcmp.ge.s32.totalorder %v1713_v37, 3 }
 0x4fb   : > { %v1688_v18 = vsel %vm364_vm2, %v666_v14, %v696_v15  ;;  %v667_v26 = vmul.f32 0.125, %v665_v24 }
 0x4fc   : > { %755 = vrot.lane.b32.xlu0 %v1688_v18, %s1508_s24  ;;  %785 = vrot.lane.b32.xlu1 %v1688_v18, %s1509_s25  ;;  %v829_v27 = vrot.slane %v1688_v18, 2 }
 0x4fd   : > { %v1697_v2 = vsel %vm364_vm2, %v667_v26, %v697_v28  ;;  %vm747_vm2 = vcmp.ge.s32.totalorder %v1713_v37, 2 }
 0x4fe   : > { %v830_v26 = vrot.slane %v1697_v2, 2 }
 0x500   : > { %770 = vrot.lane.b32.xlu0 %v1688_v18, %s1510_s26  ;;  %740 = vrot.lane.b32.xlu1 %v1688_v18, %s1511_s27 }
 0x504   : > { %725 = vrot.lane.b32.xlu0 %v1688_v18, %s1512_s28  ;;  %800 = vrot.lane.b32.xlu1 %v1688_v18, %s1513_s29  ;;  %v196_v18 = vld [vmem:[%s1890_s2 + $0x28] sm:$0xf] }
 0x508   : > { %787 = vrot.lane.b32.xlu1 %v1697_v2, %s1509_s25 }
 0x50c   : > { %742 = vrot.lane.b32.xlu1 %v1697_v2, %s1511_s27 }
 0x510   : > { %802 = vrot.lane.b32.xlu1 %v1697_v2, %s1513_s29 }
 0x514   : > { %757 = vrot.lane.b32.xlu1 %v1697_v2, %s1508_s24  ;;  %s176_s24 = sand.u32 1, %s1492_s13  }
 0x515   : > { %s1310_s25 = sshll.u32 %s176_s24, 3  ;;  %s1221_s5 = scalar_lea.sflag [#allocation3], %s176_s24 }
 0x516   : > { %s178_s27 = scalar_lea.vmem [#allocation2], %s1310_s25 }
 0x518   : > { %772 = vrot.lane.b32.xlu1 %v1697_v2, %s1510_s26  ;;  %s1344_s26 = sshll.u32 %s1562_s16, 7  ;;  %s1446_s16 = scalar_lea.vmem %s1445_s8, 256 }
 0x519   : > { %s1233_s4 = scalar_lea.hbm %s1891_s3, %s1344_s26 }
 0x51c   : > { %727 = vrot.lane.b32.xlu1 %v1697_v2, %s1512_s28  ;;  %s1235_s28 = sshll.u32 %s178_s27, 4  ;;  %s1236_s28 = int_to_ptr.vmem [resolvable:$true] %s1235_s28 }
 0x51d   : > { %s1440_s6 = scalar_lea.vmem %s1236_s28, 128  ;;  %p1447_p0 = scmp.lt.s32.totalorder %s1236_s28, %s1445_s8 }
 0x51e   : > { %p1441_p11 = scmp.ne.s32.totalorder %s1236_s28, %s1440_s6  ;;  %p1448_p1 = scmp.lt.s32.totalorder %s1446_s16, %s1440_s6 }
 0x520   : > { %p1442_p12 = pnand %p1441_p11, %p1579_p5  ;;  %p1449_p2 = por %p1448_p1, %p1447_p0 }
 0x522   : > { %p1443_p13 = pneg %p1442_p12 }
 0x524   : > { %p1450_p3 = pnand %p1449_p2, %p1443_p13 }
 0x56e   : > { %v786_v31 = vpop.permute.xlu1 %785  ;;  %v756_v39 = vpop.permute.xlu0 %755 }
 0x572   : > { %v741_v32 = vpop.permute.xlu1 %740  ;;  %v771_v47 = vpop.permute.xlu0 %770 }
 0x576   : > { %v801_v33 = vpop.permute.xlu1 %800  ;;  %v726_v9 = vpop.permute.xlu0 %725 }
 0x57a   : > { %v788_v34 = vpop.permute.xlu1 %787 }
 0x57b   : > { %v790_v41 = vsel %vm789_vm11, %v786_v31, %v788_v34  ;;  %v791_v1 = vsel %vm789_vm11, %v788_v34, %v786_v31  ;;  %vm777_vm11 = vcmp.lt.s32.totalorder %v1713_v37, 15 }
 0x57c   : > { %v798_v45 = vsel %vm792_vm12, %v790_v41, 0.0  ;;  %v799_v46 = vsel %vm793_vm13, %v791_v1, 0.0  ;;  %vm733_vm12 = vcmp.ge.s32.totalorder %v1716_v38, 3  ;;  %vm849_vm13 = vcmask 1045504  }
 0x57d   : > { %v835_v52 = vrot.slane %v798_v45, 6  ;;  %v836_v53 = vrot.slane %v799_v46, 6 }
 0x57e   : > { %v743_v36 = vpop.permute.xlu1 %742 }
 0x57f   : > { %v745_v48 = vsel %vm744_vm14, %v741_v32, %v743_v36  ;;  %v746_v49 = vsel %vm744_vm14, %v743_v36, %v741_v32  ;;  %vm1896_vm14 = vcmask 1043456  }
 0x580   : > { %v753_v58 = vsel %vm747_vm2, %v746_v49, 0.0  ;;  %v754_v59 = vsel %vm748_vm4, %v745_v48, 0.0  ;;  %vm1897_vm2 = vmmov %vm1896_vm14 }
 0x581   : > { %v817_v13 = vrot.slane %v753_v58, 6  ;;  %v818_v14 = vrot.slane %v754_v59, 6 }
 0x582   : > { %v803_v40 = vpop.permute.xlu1 %802 }
 0x583   : > { %v805_v42 = vsel %vm804_vm15, %v801_v33, %v803_v40  ;;  %v806_v43 = vsel %vm804_vm15, %v803_v40, %v801_v33  ;;  %vm729_vm15 = vcmp.lt.s32.totalorder %v1651_v57, 3  ;;  %v198_v33 = vld [vmem:[%s1890_s2 + $0x38] sm:$0xff] }
 0x584   : > { %v813_v50 = vsel %vm807_vm5, %v805_v42, 0.0  ;;  %v814_v51 = vsel %vm808_vm6, %v806_v43, 0.0  ;;  %vm1902_vm6 = vcmask 31744  }
 0x585   : > { %v841_v62 = vrot.slane %v813_v50, 4  ;;  %v842_v63 = vrot.slane %v814_v51, 4 }
 0x586   : > { %v758_v44 = vpop.permute.xlu1 %757 }
 0x587   : > { %v760_v54 = vsel %vm759_vm7, %v756_v39, %v758_v44  ;;  %v761_v55 = vsel %vm759_vm7, %v758_v44, %v756_v39  ;;  %vm969_vm7 = vcmp.lt.s32.totalorder %v1651_v57, 16 }
 0x588   : > { %v768_v5 = vsel %vm762_vm8, %v761_v55, 0.0  ;;  %v769_v6 = vsel %vm763_vm9, %v760_v54, 0.0  ;;  %vm954_vm8 = vcmp.lt.s32.totalorder %v1651_v57, 32  ;;  %vm972_vm9 = vcmp.ge.s32.totalorder %v1651_v57, 16 }
 0x589   : > { %v823_v17 = vrot.slane %v768_v5, 4  ;;  %v824_v21 = vrot.slane %v769_v6, 4 }
 0x58a   : > { %v773_v56 = vpop.permute.xlu1 %772 }
 0x58b   : > { %v775_v60 = vsel %vm774_vm10, %v771_v47, %v773_v56  ;;  %v776_v61 = vsel %vm774_vm10, %v773_v56, %v771_v47  ;;  %vm937_vm10 = vcmp.lt.s32.totalorder %v1651_v57, 48 }
 0x58c   : > { %v783_v3 = vsel %vm777_vm11, %v775_v60, 0.0  ;;  %v784_v4 = vsel %vm778_vm1, %v776_v61, 0.0  ;;  %vm1898_vm1 = vmmov %vm1897_vm2  ;;  %vm957_vm11 = vcmp.ge.s32.totalorder %v1651_v57, 32 }
 0x58d   : > { %v852_v7 = vsel %vm367_vm3, %v783_v3, %v835_v52  ;;  %v853_v8 = vsel %vm367_vm3, %v784_v4, %v836_v53  ;;  %vm1899_vm4 = vmmov %vm1898_vm1 }
 0x58e   : > { %v728_v10 = vpop.permute.xlu1 %727  ;;  %v855_v11 = vsel %vm1896_vm14, %v853_v8, %v842_v63  ;;  %v854_v12 = vsel %vm1897_vm2, %v852_v7, %v841_v62  ;;  %vm1901_vm5 = vmmov %vm1898_vm1  ;;  %vm1003_vm14 = vcmp.lt.s32.totalorder %v1710_v35, 224  ;;  %vm988_vm2 = vcmp.lt.s32.totalorder %v1710_v35, 240 }
 0x58f   : > { %v730_v15 = vsel %vm729_vm15, %v726_v9, %v728_v10  ;;  %v731_v16 = vsel %vm729_vm15, %v728_v10, %v726_v9  ;;  %1326 = vmatprep.subr.msk.mxu0 %vm849_vm13, %v855_v11  ;;  %vm984_vm15 = vcmp.lt.s32.totalorder %v1651_v57, 112 }
 0x590   : > { %v738_v22 = vsel %vm732_vm0, %v731_v16, 0.0  ;;  %v739_v23 = vsel %vm733_vm12, %v730_v15, 0.0  ;;  %1327 = vmatpush1.msk.msra.mxu0 %vm849_vm13, %v854_v12  ;;  %vm858_vm0 = vcmask 130048   ;;  %vm999_vm12 = vcmp.lt.s32.totalorder %v1651_v57, 96 }
 0x591   : > { %v845_v24 = vsel %vm367_vm3, %v738_v22, %v817_v13  ;;  %v846_v25 = vsel %vm367_vm3, %v739_v23, %v818_v14  ;;  %vm1900_vm3 = vmmov %vm1898_vm1 }
 0x592   : > { %v848_v28 = vsel %vm1898_vm1, %v846_v25, %v824_v21  ;;  %v847_v29 = vsel %vm1899_vm4, %v845_v24, %v823_v17  ;;  %vm1014_vm1 = vcmp.lt.s32.totalorder %v1651_v57, 80  ;;  %vm1018_vm4 = vcmp.lt.s32.totalorder %v1710_v35, 208 }
 0x593   : > { %v851_v31 = vsel %vm849_vm13, %v848_v28, %v830_v26  ;;  %v850_v32 = vsel %vm849_vm13, %v847_v29, %v829_v27  ;;  %vm940_vm13 = vcmp.ge.s32.totalorder %v1651_v57, 48 }
 0x594   : > { %892 = vmatprep.subr.mxu0 %v851_v31 }
 0x595   : > { %893 = vmatpush1.msra.mxu0 %v850_v32 }
 0x596   : > { %1328 = vmatmul.mubr.msk.f32.vlgmr.msra.gmra.mxu0 %vm858_vm0, %v198_v33  ;;  %1334 = vmatprep.subr.msk.mxu0 %vm1900_vm3, %v1670_v20 }
 0x597   : > { %1335 = vmatpush1.msk.msra.mxu0 %vm1901_vm5, %v1666_v19  ;;  %1198 = vmatprep.mubr.f32.mxu0 %v1502_v0 }
 0x59a   : > { %1336 = vmatmul.mubr.msk.f32.vlgmr.msra.gmra.mxu0 %vm1902_vm6, %v196_v18 }
 0x5ae   : > { %v1122_v18 = vpop.f32.mrf.mxu1 }
 0x656   : > { %v1802_v2 = vpop.f32.mrf.mxu0 }
 0x657   : > { %933 = vrot.lane.b32.xlu0 %v1802_v2, %s1514_s9  ;;  %v946_v20 = vrot.slane %v1802_v2, 1  ;;  %v961_v19 = vrot.slane %v1802_v2, 2  ;;  %v976_v37 = vrot.slane %v1802_v2, 4  ;;  %v991_v39 = vrot.slane %v1802_v2, 5 }
 0x658   : > { %v1805_v34 = vpop.f32.mrf.mxu0  ;;  %v1006_v41 = vrot.slane %v1802_v2, 6  ;;  %v1023_v53 = vrot.slane %v1802_v2, 3 }
 0x659   : > { %935 = vrot.lane.b32.xlu1 %v1805_v34, %s1514_s9  ;;  %v947_v0 = vrot.slane %v1805_v34, 1  ;;  %v962_v36 = vrot.slane %v1805_v34, 2  ;;  %v977_v38 = vrot.slane %v1805_v34, 4  ;;  %v992_v40 = vrot.slane %v1805_v34, 5 }
 0x65a   : > { %v1007_v1 = vrot.slane %v1805_v34, 6  ;;  %v1024_v56 = vrot.slane %v1805_v34, 3  ;;  %v1200_v2 = vpop.f32.mrf.mxu0 }
 0x65b   : > { %950 = vrot.lane.b32.xlu0 %v946_v20, %s1515_s10  ;;  %v1201_v34 = vadd.f32 %v1200_v2, %v1122_v18  ;;  %v1124_v20 = vpop.f32.mrf.mxu1 }
 0x65d   : > { %952 = vrot.lane.b32.xlu1 %v947_v0, %s1515_s10  ;;  %v1202_v0 = vpop.f32.mrf.mxu0 }
 0x65f   : > { %965 = vrot.lane.b32.xlu0 %v961_v19, %s1516_s11 }
 0x661   : > { %967 = vrot.lane.b32.xlu1 %v962_v36, %s1516_s11 }
 0x663   : > { %980 = vrot.lane.b32.xlu0 %v976_v37, %s1517_s17 }
 0x665   : > { %982 = vrot.lane.b32.xlu1 %v977_v38, %s1517_s17  ;;  %v1203_v38 = vadd.f32 %v1202_v0, %v1124_v20 }
 0x667   : > { %995 = vrot.lane.b32.xlu0 %v991_v39, %s1518_s19 }
 0x669   : > { %997 = vrot.lane.b32.xlu1 %v992_v40, %s1518_s19 }
 0x66b   : > { %1010 = vrot.lane.b32.xlu0 %v1006_v41, %s1519_s20 }
 0x66d   : > { %1012 = vrot.lane.b32.xlu1 %v1007_v1, %s1519_s20 }
 0x6c9   : > { %v934_v42 = vpop.permute.xlu0 %933 }
 0x6cb   : > { %v936_v43 = vpop.permute.xlu1 %935 }
 0x6cc   : > { %v939_v55 = vsel %vm937_vm10, %v936_v43, %v934_v42  ;;  %v938_v9 = vsel %vm937_vm10, %v934_v42, %v936_v43 }
 0x6cd   : > { %v951_v44 = vpop.permute.xlu0 %950  ;;  %v942_v6 = vsel %vm940_vm13, %v939_v55, 0.0 }
 0x6cf   : > { %v953_v45 = vpop.permute.xlu1 %952 }
 0x6d0   : > { %v956_v51 = vsel %vm954_vm8, %v953_v45, %v951_v44  ;;  %v955_v3 = vsel %vm954_vm8, %v951_v44, %v953_v45 }
 0x6d1   : > { %v966_v46 = vpop.permute.xlu0 %965  ;;  %v959_v60 = vsel %vm957_vm11, %v956_v51, 0.0  ;;  %v1022_v15 = vadd.f32 %v955_v3, %v938_v9 }
 0x6d2   : > { %v1021_v10 = vadd.f32 %v959_v60, %v942_v6 }
 0x6d3   : > { %v968_v47 = vpop.permute.xlu1 %967 }
 0x6d4   : > { %v971_v49 = vsel %vm969_vm7, %v968_v47, %v966_v46  ;;  %v970_v58 = vsel %vm969_vm7, %v966_v46, %v968_v47 }
 0x6d5   : > { %v981_v48 = vpop.permute.xlu0 %980  ;;  %v974_v54 = vsel %vm972_vm9, %v971_v49, 0.0  ;;  %v1028_v7 = vadd.f32 %v1024_v56, %v970_v58 }
 0x6d6   : > { %v1027_v4 = vadd.f32 %v1023_v53, %v974_v54 }
 0x6d7   : > { %v983_v50 = vpop.permute.xlu1 %982  ;;  %v1032_v25 = vadd.f32 %v1028_v7, %v1022_v15 }
 0x6d8   : > { %v986_v61 = vsel %vm984_vm15, %v983_v50, %v981_v48  ;;  %v985_v8 = vsel %vm984_vm15, %v981_v48, %v983_v50  ;;  %v1031_v22 = vadd.f32 %v1027_v4, %v1021_v10 }
 0x6d9   : > { %v996_v52 = vpop.permute.xlu0 %995  ;;  %v990_v11 = vsel %vm988_vm2, %v986_v61, 0.0 }
 0x6db   : > { %v998_v59 = vpop.permute.xlu1 %997 }
 0x6dc   : > { %v1000_v62 = vsel %vm999_vm12, %v996_v52, %v998_v59  ;;  %v1001_v63 = vsel %vm999_vm12, %v998_v59, %v996_v52 }
 0x6dd   : > { %v1005_v5 = vsel %vm1003_vm14, %v1001_v63, 0.0  ;;  %v1029_v12 = vadd.f32 %v1000_v62, %v985_v8  ;;  %v1011_v13 = vpop.permute.xlu0 %1010 }
 0x6de   : > { %v1030_v16 = vadd.f32 %v1005_v5, %v990_v11 }
 0x6df   : > { %v1013_v14 = vpop.permute.xlu1 %1012 }
 0x6e0   : > { %v1015_v17 = vsel %vm1014_vm1, %v1011_v13, %v1013_v14  ;;  %v1016_v21 = vsel %vm1014_vm1, %v1013_v14, %v1011_v13 }
 0x6e1   : > { %v1020_v23 = vsel %vm1018_vm4, %v1016_v21, 0.0  ;;  %v1033_v24 = vadd.f32 %v1029_v12, %v1015_v17 }
 0x6e2   : > { %v1034_v26 = vadd.f32 %v1030_v16, %v1020_v23 }
 0x6e3   : > { %v1035_v27 = vadd.f32 %v1033_v24, %v1031_v22 }
 0x6e4   : > { %v1036_v57 = vadd.f32 %v1034_v26, %v1032_v25 }
 0x6e5   : > { %v1329_v28 = vmul.f32 -1.442695, %v1035_v27 }
 0x6e6   : > { %v1330_v29 = vmul.f32 -1.442695, %v1036_v57 }
 0x6e7   : > { %1432 = vpow2.f32 %v1329_v28 }
 0x6e8   : > { %1434 = vpow2.f32 %v1330_v29 }
 0x6f4   : > { %v1433_v35 = vpop.eup %1432 }
 0x6f5   : > { %v1435_v31 = vpop.eup %1434  ;;  %v1043_v32 = vadd.f32 1.0, %v1433_v35 }
 0x6f6   : > { %v1044_v33 = vadd.f32 1.0, %v1435_v31 }
 0x6f7   : > { %1436 = vrcp.f32 %v1043_v32 }
 0x6f8   : > { %1438 = vrcp.f32 %v1044_v33 }
 0x704   : > { %v1437_v19 = vpop.eup %1436 }
 0x705   : > { %v1439_v36 = vpop.eup %1438  ;;  %v1208_v37 = vrot.slane %v1437_v19, %v1629_v30 }
 0x706   : > { %v1212_v39 = vrot.slane %v1439_v36, %v1629_v30 }
 0x707   : > { %v1213_v40 = vmul.f32 %v1208_v37, %v1201_v34 }
 0x708   : > { %v1214_v41 = vmul.f32 %v1212_v39, %v1203_v38 }
 0x70a   : > { %v1217_v1 = vcombine.low %v1213_v40, %v1214_v41 }
 0x70c   : > { %1219 = vst [vmem:[%s178_s27] sm:$0xff] %v1217_v1 }
 0x70d   : > { %1453 = shalt.err (!%p1450_p3)
}
 0x70e   : > { %s1454_s9 = scalar_lea.hbm %s1233_s4, 128  ;;  %s1458_s17 = scalar_lea.hbm %s1891_s3, 256 }
 0x70f   : > { %p1455_p4 = scmp.ne.s32.totalorder %s1233_s4, %s1454_s9  ;;  %p1459_p9 = scmp.lt.s32.totalorder %s1233_s4, %s1891_s3 }
 0x710   : > { %p1460_p10 = scmp.lt.s32.totalorder %s1458_s17, %s1454_s9 }
 0x711   : > { %p1456_p7 = pnand %p1455_p4, %p1579_p5 }
 0x712   : > { %p1461_p11 = por %p1460_p10, %p1459_p9 }
 0x713   : > { %p1457_p8 = pneg %p1456_p7 }
 0x715   : > { %p1462_p12 = pnand %p1461_p11, %p1457_p8 }
 0x717   : > { %1465 = shalt.err (!%p1462_p12)
}
 0x718   : > { %1359 = dma.vmem_to_hbm [thread:$0]  (%p1579_p5), %s1236_s28, 128, %s1233_s4, %s1221_s5  }
 0x719 PF: > { %p1365_p13 = scmp.ge.s32.totalorder %s1500_s15, 2  ;;  %s1247_s24 = sand.u32 1, %s1488_s12  }
 0x71a   : > { %s1248_s25 = scalar_lea.sflag [#allocation3], %s1247_s24 }
 0x71b   : > { %p1362_p0 = pnand %p1365_p13, %p1583_p6 }
 0x71d   : > { %p1363_p1 = pneg %p1362_p0 }
 0x71f   : > { %1483 = dma.done.wait (%p1363_p1), %s1248_s25, 128  }
 0x720   : > { %1485 = vsyncadd (%p1363_p1), %s1248_s25, 4294967168  ;;  %p13_p2 = scmp.ge.s32.totalorder %s1566_s18, 4   ;;  %s1903_s12 = smov %s1492_s13 }
 0x721   : > { %s1904_s13 = smov %s1496_s14  ;;  %s1905_s14 = smov %s1577_s21 }
 0x722   : > { %s1906_s15 = smov %s1566_s18  ;;  %15 = sbr.rel (!%p13_p2) target bundleno = 3 (0x3), region = 70 }
 0x727   :  { %1253 = vsyncpa [#allocation3], 1 }
 0x728   :  { %1255 = vsyncpa [#allocation3 + $0x1], 1 }

</bundles_post_ra>
